<compile_context>
chip_gen: v5e
topology: v5e:2x2
jax: 0.10.0
libtpu: 0.0.40
codegen_flags: <defaults>
</compile_context>

<pallas_src>
import jax
import jax.numpy as jnp
from jax.experimental import pallas as pl
from jax.experimental.pallas import tpu as pltpu

_LANE = 128
_SUBLANE = 8
_MIB = 1024 * 1024

_VMEM_BUDGET_BYTES = 28 * _MIB       # total accounted VMEM per pipeline stage set
_ROW_TARGET_BLOCK_BYTES = 8 * _MIB   # target input block size (row-streaming path)
_COL_TARGET_BLOCK_BYTES = 4 * _MIB   # target input block size (column-tiled path)


def _round_up(a: int, b: int) -> int:
    return (a + b - 1) // b * b


# --------------------------------------------------------------------------
# Path 1: row-streaming kernel (reduction dim = full HW)
# --------------------------------------------------------------------------
def _make_row_kernel(threshold: float):
    def kernel(x_ref, o_ref):
        x = x_ref[...]  # (tm, HW), native dtype (no blanket f32 upcast)
        # num = sum(x);  den = sum(where(x > thr, 1, x)) = num + sum(where(x > thr, 1 - x, 0))
        num = jnp.sum(x, axis=-1, keepdims=True, dtype=jnp.float32)
        extra = jnp.sum(jnp.where(x > threshold, 1.0 - x, 0.0),
                        axis=-1, keepdims=True, dtype=jnp.float32)
        den = num + extra
        o_ref[...] = (num / den).astype(o_ref.dtype)

    return kernel


def _row_per_row_bytes(hw_padded: int, itemsize: int) -> int:
    # double-buffered input + double-buffered lane-padded output tile
    # + allowance for one block-sized f32 compiler temporary (the where-result).
    return 2 * hw_padded * itemsize + 2 * _LANE * itemsize + hw_padded * 4


def _pick_row_tile(nc: int, hw_padded: int, itemsize: int) -> int:
    """Rows per block (multiple of 8 or full dim).  Returns 0 if even the
    minimum block does not fit the VMEM budget (-> use column-tiled path)."""
    per_row = _row_per_row_bytes(hw_padded, itemsize)
    min_rows = nc if nc < _SUBLANE else _SUBLANE
    if min_rows * per_row > _VMEM_BUDGET_BYTES:
        return 0
    if nc < _SUBLANE:
        return nc  # full-dim row block is allowed
    tm_budget = (_VMEM_BUDGET_BYTES // per_row // _SUBLANE) * _SUBLANE
    tm_target = (_ROW_TARGET_BLOCK_BYTES // max(1, hw_padded * itemsize)
                 // _SUBLANE) * _SUBLANE
    tm_target = max(tm_target, _SUBLANE)
    tm = min(tm_budget, tm_target, _round_up(nc, _SUBLANE))
    return max(tm, _SUBLANE)


# --------------------------------------------------------------------------
# Path 2: column-tiled kernel (large HW fallback, 2-D grid + accumulators)
# --------------------------------------------------------------------------
def _make_col_kernel(threshold: float, hw: int, tk: int):
    needs_mask = (hw % tk) != 0

    def kernel(x_ref, o_ref, num_acc, den_acc):
        k = pl.program_id(1)

        @pl.when(k == 0)
        def _():
            num_acc[...] = jnp.zeros_like(num_acc)
            den_acc[...] = jnp.zeros_like(den_acc)

        x = x_ref[...]  # (tm, tk), native dtype
        extra_c = jnp.where(x > threshold, 1.0 - x, 0.0)
        if needs_mask:
            col = jax.lax.broadcasted_iota(jnp.int32, x.shape, 1) + k * tk
            valid = col < hw
            x_in = jnp.where(valid, x, 0.0)
            extra_c = jnp.where(valid, extra_c, 0.0)
        else:
            x_in = x

        num = jnp.sum(x_in, axis=-1, keepdims=True, dtype=jnp.float32)
        extra = jnp.sum(extra_c, axis=-1, keepdims=True, dtype=jnp.float32)
        num_acc[...] += num
        den_acc[...] += num + extra

        @pl.when(k == pl.num_programs(1) - 1)
        def _():
            o_ref[...] = (num_acc[...] / den_acc[...]).astype(o_ref.dtype)

    return kernel


def _pick_col_tiles(nc: int, hw: int, itemsize: int):
    tm = nc if nc < _SUBLANE else _SUBLANE
    tk = (_COL_TARGET_BLOCK_BYTES // max(1, tm * itemsize) // _LANE) * _LANE
    tk = max(tk, _LANE)
    tk = min(tk, _round_up(hw, _LANE))
    return tm, tk


# --------------------------------------------------------------------------
# Wrapper
# --------------------------------------------------------------------------
def adaptive_partial_avgpool(x, threshold: float = 0.0, keepdims: bool = True,
                             *, col_tile: int | None = None):
    """x: (N, C, *spatial) non-negative.  Returns (N, C, 1, ..., 1) if keepdims
    else (N, C).  `col_tile` forces the column-tiled fallback (testing)."""
    N, C = x.shape[0], x.shape[1]
    spatial = x.shape[2:]
    NC = N * C
    HW = 1
    for s in spatial:
        HW *= s
    itemsize = jnp.dtype(x.dtype).itemsize
    x2d = x.reshape(NC, HW)
    hw_padded = _round_up(HW, _LANE)
    threshold = float(threshold)

    tm = 0 if col_tile is not None else _pick_row_tile(NC, hw_padded, itemsize)

    cost = pl.CostEstimate(
        flops=4 * NC * HW,  # compare, subtract, select, adds (divide negligible)
        transcendentals=0,
        bytes_accessed=NC * HW * itemsize + NC * itemsize,
    )

    if tm > 0:
        # ---- row-streaming path ----
        grid = (pl.cdiv(NC, tm),)
        est = tm * _row_per_row_bytes(hw_padded, itemsize)
        vmem_limit = int(min(56 * _MIB, max(32 * _MIB, est + 8 * _MIB)))
        out2d = pl.pallas_call(
            _make_row_kernel(threshold),
            out_shape=jax.ShapeDtypeStruct((NC, 1), x.dtype),
            grid_spec=pltpu.PrefetchScalarGridSpec(
                num_scalar_prefetch=0,
                grid=grid,
                in_specs=[pl.BlockSpec((tm, HW), lambda i: (i, 0))],
                out_specs=pl.BlockSpec((tm, 1), lambda i: (i, 0)),
            ),
            compiler_params=pltpu.CompilerParams(
                dimension_semantics=("parallel",),
                vmem_limit_bytes=vmem_limit,
            ),
            cost_estimate=cost,
        )(x2d)
    else:
        # ---- column-tiled fallback (huge HW, or forced for testing) ----
        if col_tile is not None:
            tm = NC if NC < _SUBLANE else _SUBLANE
            tk = int(col_tile)
        else:
            tm, tk = _pick_col_tiles(NC, HW, itemsize)
        grid = (pl.cdiv(NC, tm), pl.cdiv(HW, tk))
        est = 2 * tm * tk * itemsize + 2 * tm * _LANE * itemsize + 3 * tm * tk * 4
        vmem_limit = int(min(56 * _MIB, max(32 * _MIB, est + 8 * _MIB)))
        out2d = pl.pallas_call(
            _make_col_kernel(threshold, HW, tk),
            out_shape=jax.ShapeDtypeStruct((NC, 1), x.dtype),
            grid_spec=pltpu.PrefetchScalarGridSpec(
                num_scalar_prefetch=0,
                grid=grid,
                in_specs=[pl.BlockSpec((tm, tk), lambda i, k: (i, k))],
                out_specs=pl.BlockSpec((tm, 1), lambda i, k: (i, 0)),
                scratch_shapes=[pltpu.VMEM((tm, 1), jnp.float32),
                                pltpu.VMEM((tm, 1), jnp.float32)],
            ),
            compiler_params=pltpu.CompilerParams(
                dimension_semantics=("parallel", "arbitrary"),
                vmem_limit_bytes=vmem_limit,
            ),
            cost_estimate=cost,
        )(x2d)

    if keepdims:
        return out2d.reshape((N, C) + (1,) * len(spatial))
    return out2d.reshape(N, C)


def _reference(x, threshold=0.0):
    axes = tuple(range(2, x.ndim))
    xx = jnp.where(x > threshold, jnp.ones_like(x), x)
    num = jnp.sum(x, axis=axes, keepdims=True)
    den = jnp.sum(xx, axis=axes, keepdims=True)
    return num / den


if __name__ == "__main__":
    key = jax.random.PRNGKey(0)
    N, C, H, W = 2, 4, 16, 16
    # Non-negative input with some exact zeros (relu of normal).
    x = jnp.maximum(jax.random.normal(key, (N, C, H, W), dtype=jnp.float32), 0.0)

    ref = _reference(x, 0.0)

    # Main (row-streaming) path.
    out = adaptive_partial_avgpool(x, threshold=0.0, keepdims=True)
    out = jax.block_until_ready(out)
    assert out.shape == (N, C, 1, 1), out.shape
    assert jnp.allclose(out, ref, rtol=1e-5, atol=1e-5), (out, ref)

    out_flat = adaptive_partial_avgpool(x, threshold=0.0, keepdims=False)
    out_flat = jax.block_until_ready(out_flat)
    assert out_flat.shape == (N, C), out_flat.shape
    assert jnp.allclose(out_flat, ref.reshape(N, C), rtol=1e-5, atol=1e-5)

    # Exercise the large-HW fallback (column-tiled reduction with accumulators).
    out_col = adaptive_partial_avgpool(x, threshold=0.0, keepdims=True, col_tile=128)
    out_col = jax.block_until_ready(out_col)
    assert jnp.allclose(out_col, ref, rtol=1e-5, atol=1e-5), (out_col, ref)

    # Non-zero threshold sanity check.
    out_thr = adaptive_partial_avgpool(x, threshold=0.5, keepdims=True)
    out_thr = jax.block_until_ready(out_thr)
    ref_thr = _reference(x, 0.5)
    assert jnp.allclose(out_thr, ref_thr, rtol=1e-5, atol=1e-5), (out_thr, ref_thr)

    print("KERNEL_OK")
</pallas_src>

<mosaic_0001>
module attributes {stable_mosaic.version = 11 : i64} {
  func.func @kernel(%arg0: i32, %arg1: memref<8x256xf32, #tpu.memory_space<vmem>>, %arg2: memref<8x1xf32, #tpu.memory_space<vmem>>) attributes {dimension_semantics = [#tpu.dimension_semantics<parallel>], iteration_bounds = array<i64: 1>, scalar_prefetch = 0 : i64, scratch_operands = 0 : i64, tpu.core_type = #tpu.core_type<tc>, window_params = [{transform_indices = @transform_0, window_bounds = array<i64: 8, 256>}, {transform_indices = @transform_1, window_bounds = array<i64: 8, 1>}]} {
    %c0 = arith.constant 0 : index
    %c0_0 = arith.constant 0 : index
    %0 = vector.load %arg1[%c0, %c0_0] : memref<8x256xf32, #tpu.memory_space<vmem>>, vector<8x256xf32>
    %cst = arith.constant dense<0.000000e+00> : vector<8xf32>
    %1 = vector.multi_reduction <add>, %0, %cst [1] : vector<8x256xf32> to vector<8xf32>
    %2 = vector.shape_cast %1 : vector<8xf32> to vector<8x1xf32>
    %cst_1 = arith.constant 0.000000e+00 : f32
    %3 = vector.broadcast %cst_1 : f32 to vector<8x256xf32>
    %4 = arith.cmpf ogt, %0, %3 : vector<8x256xf32>
    %cst_2 = arith.constant 1.000000e+00 : f32
    %5 = vector.broadcast %cst_2 : f32 to vector<8x256xf32>
    %6 = arith.subf %5, %0 : vector<8x256xf32>
    %cst_3 = arith.constant 0.000000e+00 : f32
    %7 = vector.broadcast %cst_3 : f32 to vector<8x256xf32>
    %8 = arith.select %4, %6, %7 : vector<8x256xi1>, vector<8x256xf32>
    %cst_4 = arith.constant dense<0.000000e+00> : vector<8xf32>
    %9 = vector.multi_reduction <add>, %8, %cst_4 [1] : vector<8x256xf32> to vector<8xf32>
    %10 = vector.shape_cast %9 : vector<8xf32> to vector<8x1xf32>
    %11 = arith.addf %2, %10 : vector<8x1xf32>
    %12 = arith.divf %2, %11 : vector<8x1xf32>
    %c0_5 = arith.constant 0 : index
    %c0_6 = arith.constant 0 : index
    %13 = vector.load %arg2[%c0_5, %c0_6] : memref<8x1xf32, #tpu.memory_space<vmem>>, vector<8x1xf32>
    tpu.vector_store %arg2[%c0_5, %c0_6], %12 {strides = array<i32>} : memref<8x1xf32, #tpu.memory_space<vmem>>, vector<8x1xf32>,
    return
  }
  func.func @transform_0(%arg0: i32) -> (i32, i32) {
    %c0_i32 = arith.constant 0 : i32
    %c0_i32_0 = arith.constant 0 : i32
    return %arg0, %c0_i32 : i32, i32
  }
  func.func @transform_1(%arg0: i32) -> (i32, i32) {
    %c0_i32 = arith.constant 0 : i32
    %c0_i32_0 = arith.constant 0 : i32
    return %arg0, %c0_i32 : i32, i32
  }
}

</mosaic_0001>

<bundles_post_ra>
// kernel: tpu_custom_call.1
= control target key start
LH: loop header
LB: loop body
LE: loop exit
PB: predicated region body
PF: predicated region fallthrough
CT: control target
= control target key end

     0   :  { %6 = vsyncpa [#allocation3], 0  ;;  %s88_s9 = smov [#allocation2]   ;;  %s105_s0 = inlined_call_operand.hbm [shape: f32[8,256], index: 0, kind: input, shape index: {}]   ;;  %s106_s1 = inlined_call_operand.vmem [shape: f32[8,1], index: 1, kind: output, shape index: {}]  }
   0x1   :  { %s12_s8 = sshll.u32 %s105_s0, 4  ;;  %s14_s10 = sshll.u32 %s88_s9, 4  ;;  %s13_s8 = int_to_ptr.hbm [resolvable:$true] %s12_s8  ;;  %s15_s10 = int_to_ptr.vmem [resolvable:$true] %s14_s10 }
   0x2   :  { %17 = dma.hbm_to_vmem [thread:$0]  %s13_s8, 256, %s15_s10, [#allocation3]  }
   0x3   :  { %86 = dma.done.wait [#allocation3], 256  }
   0x4   :  { %87 = vsyncadd [#allocation3], 4294967040  ;;  %v22_v0 = vld [vmem:[#allocation2] sm:$0xff]  ;;  %v23_v1 = vld [vmem:[#allocation2 + $0x8] sm:$0xff]  ;;  %vm52_vm6 = vcmask 7168  }
   0x5   :  { %v24_v2 = vadd.f32 %v23_v1, %v22_v0  ;;  %vm27_vm0 = vcmp.gt.f32.partialorder %v22_v0, 0.0  ;;  %vm28_vm1 = vcmp.gt.f32.partialorder %v23_v1, 0.0  ;;  %v29_v3 = vsub.f32 1.0, %v22_v0 }
   0x6   :  { %v30_v4 = vsub.f32 1.0, %v23_v1 }
   0x7   :  { %25 = vadd.xlane.f32.xlu0 %v24_v2  ;;  %v31_v5 = vsel %vm27_vm0, %v29_v3, 0.0 }
   0x8   :  { %v32_v6 = vsel %vm28_vm1, %v30_v4, 0.0 }
   0x9   :  { %v33_v7 = vadd.f32 %v32_v6, %v31_v5 }
   0xf   :  { %34 = vadd.xlane.f32.xlu0 %v33_v7 }
  0x7a   :  { %v26_v8 = vpop.xlane.xlu0 %25 }
  0x82   :  { %v35_v9 = vpop.xlane.xlu0 %34 }
  0x83   :  { %v36_v10 = vadd.f32 %v35_v9, %v26_v8 }
  0x85   :  { %60 = vrcp.f32 %v36_v10  ;;  %v48_v14 = vand.u32 2147483648, %v36_v10  ;;  %v46_v16 = vand.u32 2147483647, %v36_v10  ;;  %vm42_vm3 = vweird.f32 %v36_v10 }
  0x87   :  { %v49_v18 = vor.u32 1.1754944e-38, %v48_v14  ;;  %vm47_vm5 = vcmp.eq.f32.partialorder %v46_v16, 8.507059e+37 }
  0x8b   :  { %v61_v11 = vpop.eup %60 }
  0x8c   :  { %v38_v12 = vmul.f32 %v61_v11, %v36_v10  ;;  %vm43_vm2 = vweird.f32 %v61_v11 }
  0x8d   :  { %vm44_vm4 = vmor %vm42_vm3, %vm43_vm2 }
  0x8e   :  { %v39_v13 = vsub.f32 1.0, %v38_v12 }
  0x90   :  { %v40_v15 = vmul.f32 %v61_v11, %v39_v13 }
  0x92   :  { %v41_v17 = vadd.f32 %v61_v11, %v40_v15 }
  0x94   :  { %v45_v19 = vsel %vm44_vm4, %v61_v11, %v41_v17 }
  0x95   :  { %v50_v20 = vsel %vm47_vm5, %v49_v18, %v45_v19 }
  0x96   :  { %v51_v21 = vmul.f32 %v50_v20, %v26_v8 }
  0x98   :  { %53 = vst.msk [vmem:[%s106_s1] sm:$0xff] %vm52_vm6, %v51_v21 }
  0x99   :  { %58 = vsyncpa [#allocation3], 1 }

</bundles_post_ra>
